<compile_context>
chip_gen: v7x
topology: tpu7x:2x2x1
jax: 0.10.0
libtpu: 0.0.40
codegen_flags: <defaults>
</compile_context>

<pallas_src>
import functools

import jax
import jax.numpy as jnp
from jax.experimental import pallas as pl
from jax.experimental.pallas import tpu as pltpu

DT = 0.1
LANES = 128
SUBLANES = 8
# (3 + 2) * 2048 * 128 * 4 B = 5 MiB useful per grid step, ~10 MiB double-buffered.
TILE_ROWS_MAX = 2048


def _round_up(x, m):
    return ((x + m - 1) // m) * m


def _make_kernel(dt):
    dt = float(dt)

    def kernel(xu_ref, o_ref):
        # xu_ref: (3, tile_rows, 128) -- [pos, vel, u]; sublanes+lanes = batch
        # o_ref : (2, tile_rows, 128) -- [pos_next, vel_next]
        x0 = xu_ref[0]
        x1 = xu_ref[1]
        u = xu_ref[2]
        o_ref[0] = (x0 + dt * x1).astype(o_ref.dtype)
        o_ref[1] = (x1 + dt * u).astype(o_ref.dtype)

    return kernel


def _pick_tile_rows(rows):
    # Aim for >= 2 grid steps (v7x 2-TC sharding) while capping per-step VMEM.
    half = _round_up(pl.cdiv(rows, 2), SUBLANES)
    return min(TILE_ROWS_MAX, max(SUBLANES, half))


def _double_integrator_soa3d(xu_soa, dt):
    """xu_soa: (3, rows, 128) -> (2, rows, 128). rows must be a multiple of 8."""
    _, rows, _ = xu_soa.shape
    tile_rows = _pick_tile_rows(rows)
    grid = (pl.cdiv(rows, tile_rows),)
    return pl.pallas_call(
        _make_kernel(dt),
        out_shape=jax.ShapeDtypeStruct((2, rows, LANES), xu_soa.dtype),
        grid=grid,
        in_specs=[pl.BlockSpec((3, tile_rows, LANES), lambda i: (0, i, 0))],
        out_specs=pl.BlockSpec((2, tile_rows, LANES), lambda i: (0, i, 0)),
        compiler_params=pltpu.CompilerParams(
            dimension_semantics=("parallel",),
        ),
    )(xu_soa)


@functools.partial(jax.jit, static_argnames=("dt",))
def double_integrator_dynamics_soa(xu_cols, *, dt=DT):
    """SoA entry point for rollout use: xu_cols (3, N) -> (2, N); no transpose."""
    _, n = xu_cols.shape
    n_pad = _round_up(max(n, 1), SUBLANES * LANES)
    xu_soa = jnp.pad(xu_cols, ((0, 0), (0, n_pad - n))).reshape(
        3, n_pad // LANES, LANES)
    out = _double_integrator_soa3d(xu_soa, dt)
    return out.reshape(2, n_pad)[:, :n]


@functools.partial(jax.jit, static_argnames=("dt",))
def double_integrator_dynamics(xu, *, dt=DT):
    """AoS entry point matching the PyTorch module: xu (N, 3) -> (N, 2).

    The row-major (N, 3) contract forces one layout-change copy (batch -> lanes);
    under jit the pad + transpose + reshape fuse into that single copy.
    """
    n = xu.shape[0]
    n_pad = _round_up(max(n, 1), SUBLANES * LANES)
    xu_soa = jnp.pad(xu, ((0, n_pad - n), (0, 0))).T.reshape(
        3, n_pad // LANES, LANES)
    out = _double_integrator_soa3d(xu_soa, dt)
    return out.reshape(2, n_pad)[:, :n].T


if __name__ == "__main__":
    # Deterministic parameters, exactly as in the module's __init__.
    a_weight = jnp.array([[1.0, DT], [0.0, 1.0]], dtype=jnp.float32)  # A.weight (2, 2)
    b_weight = jnp.array([[0.0], [DT]], dtype=jnp.float32)            # B.weight (2, 1)

    key = jax.random.PRNGKey(0)
    for n in (8, 300):  # 300 exercises the padded tail path
        xu = jax.random.normal(jax.random.fold_in(key, n), (n, 3), dtype=jnp.float32)

        out = jax.block_until_ready(double_integrator_dynamics(xu, dt=DT))

        # Pure-JAX reference: A(x) + B(u).
        ref = xu[:, 0:2] @ a_weight.T + xu[:, 2:3] @ b_weight.T

        assert out.shape == (n, 2) and out.dtype == jnp.float32
        assert jnp.allclose(out, ref, atol=1e-6, rtol=1e-6), (n, out, ref)

    print("KERNEL_OK")
</pallas_src>

<mosaic_0001>
module attributes {stable_mosaic.version = 11 : i64} {
  func.func @kernel(%arg0: i32, %arg1: memref<3x8x128xf32, #tpu.memory_space<vmem>>, %arg2: memref<2x8x128xf32, #tpu.memory_space<vmem>>) attributes {dimension_semantics = [#tpu.dimension_semantics<parallel>], iteration_bounds = array<i64: 1>, scalar_prefetch = 0 : i64, scratch_operands = 0 : i64, tpu.core_type = #tpu.core_type<tc>, window_params = [{transform_indices = @transform_0, window_bounds = array<i64: 3, 8, 128>}, {transform_indices = @transform_1, window_bounds = array<i64: 2, 8, 128>}]} {
    %c0 = arith.constant 0 : index
    %c0_0 = arith.constant 0 : index
    %c0_1 = arith.constant 0 : index
    %0 = vector.load %arg1[%c0, %c0_0, %c0_1] : memref<3x8x128xf32, #tpu.memory_space<vmem>>, vector<1x8x128xf32>
    %1 = vector.shape_cast %0 : vector<1x8x128xf32> to vector<8x128xf32>
    %c1 = arith.constant 1 : index
    %c0_2 = arith.constant 0 : index
    %c0_3 = arith.constant 0 : index
    %2 = vector.load %arg1[%c1, %c0_2, %c0_3] : memref<3x8x128xf32, #tpu.memory_space<vmem>>, vector<1x8x128xf32>
    %3 = vector.shape_cast %2 : vector<1x8x128xf32> to vector<8x128xf32>
    %c2 = arith.constant 2 : index
    %c0_4 = arith.constant 0 : index
    %c0_5 = arith.constant 0 : index
    %4 = vector.load %arg1[%c2, %c0_4, %c0_5] : memref<3x8x128xf32, #tpu.memory_space<vmem>>, vector<1x8x128xf32>
    %5 = vector.shape_cast %4 : vector<1x8x128xf32> to vector<8x128xf32>
    %cst = arith.constant 1.000000e-01 : f32
    %6 = vector.broadcast %cst : f32 to vector<8x128xf32>
    %7 = arith.mulf %6, %3 : vector<8x128xf32>
    %8 = arith.addf %1, %7 : vector<8x128xf32>
    %c0_6 = arith.constant 0 : index
    %c0_7 = arith.constant 0 : index
    %c0_8 = arith.constant 0 : index
    %9 = vector.load %arg2[%c0_6, %c0_7, %c0_8] : memref<2x8x128xf32, #tpu.memory_space<vmem>>, vector<1x8x128xf32>
    %10 = vector.shape_cast %9 : vector<1x8x128xf32> to vector<8x128xf32>
    %11 = vector.shape_cast %8 : vector<8x128xf32> to vector<1x8x128xf32>
    tpu.vector_store %arg2[%c0_6, %c0_7, %c0_8], %11 {strides = array<i32>} : memref<2x8x128xf32, #tpu.memory_space<vmem>>, vector<1x8x128xf32>,
    %cst_9 = arith.constant 1.000000e-01 : f32
    %12 = vector.broadcast %cst_9 : f32 to vector<8x128xf32>
    %13 = arith.mulf %12, %5 : vector<8x128xf32>
    %14 = arith.addf %3, %13 : vector<8x128xf32>
    %c1_10 = arith.constant 1 : index
    %c0_11 = arith.constant 0 : index
    %c0_12 = arith.constant 0 : index
    %15 = vector.load %arg2[%c1_10, %c0_11, %c0_12] : memref<2x8x128xf32, #tpu.memory_space<vmem>>, vector<1x8x128xf32>
    %16 = vector.shape_cast %15 : vector<1x8x128xf32> to vector<8x128xf32>
    %17 = vector.shape_cast %14 : vector<8x128xf32> to vector<1x8x128xf32>
    tpu.vector_store %arg2[%c1_10, %c0_11, %c0_12], %17 {strides = array<i32>} : memref<2x8x128xf32, #tpu.memory_space<vmem>>, vector<1x8x128xf32>,
    return
  }
  func.func @transform_0(%arg0: i32) -> (i32, i32, i32) {
    %c0_i32 = arith.constant 0 : i32
    %c0_i32_0 = arith.constant 0 : i32
    %c0_i32_1 = arith.constant 0 : i32
    return %c0_i32, %arg0, %c0_i32_0 : i32, i32, i32
  }
  func.func @transform_1(%arg0: i32) -> (i32, i32, i32) {
    %c0_i32 = arith.constant 0 : i32
    %c0_i32_0 = arith.constant 0 : i32
    %c0_i32_1 = arith.constant 0 : i32
    return %c0_i32, %arg0, %c0_i32_0 : i32, i32, i32
  }
}

</mosaic_0001>

<bundles_post_ra>
// kernel: double_integrator_dynamics.1
= control target key start
LH: loop header
LB: loop body
LE: loop exit
PB: predicated region body
PF: predicated region fallthrough
CT: control target
= control target key end

     0   :  { %s52_s0 = inlined_call_operand.vmem [shape: f32[3,8,128], index: 0, kind: input, shape index: {}]   ;;  %s53_s1 = inlined_call_operand.vmem [shape: f32[2,8,128], index: 1, kind: output, shape index: {}]  }
   0x1   :  { %v8_v0 = vld [vmem:[%s52_s0] sm:$0xff]  ;;  %v24_v1 = vld [vmem:[%s52_s0 + $0x8] sm:$0xff]  ;;  %v25_v2 = vld [vmem:[%s52_s0 + $0x10] sm:$0xff] }
   0x2   :  { %v13_v3 = vmul.f32 0.1, %v24_v1  ;;  %v16_v4 = vmul.f32 0.1, %v25_v2 }
   0x4   :  { %v14_v5 = vadd.f32 %v13_v3, %v8_v0  ;;  %v17_v6 = vadd.f32 %v24_v1, %v16_v4 }
   0x6   :  { %15 = vst [vmem:[%s53_s1] sm:$0xff] %v14_v5  ;;  %26 = vst [vmem:[%s53_s1 + $0x8] sm:$0xff] %v17_v6 }

</bundles_post_ra>
